<compile_context>
chip_gen: v7x
topology: tpu7x:2x2x1
jax: 0.10.0
libtpu: 0.0.40
codegen_flags: <defaults>
</compile_context>

<pallas_src>
import jax
import jax.numpy as jnp
from jax.experimental import pallas as pl
from jax.experimental.pallas import tpu as pltpu

EMBEDDING_DIM = 256
HIDDEN_DIM = 128
NEG_SLOPE = 0.01  # nn.LeakyReLU default negative_slope


def _leaky_relu(x):
    return jnp.where(x >= 0, x, NEG_SLOPE * x)


def review_classifier_kernel(idx_ref, emb_ref, w1_ref, b1_ref, w2_ref, b2_ref,
                             out_ref, acc_ref):
    """Grid = (batch tiles [parallel], vocab tiles [arbitrary / reduction])."""
    v_step = pl.program_id(1)
    TB, S = idx_ref.shape          # batch tile, sequence length (static)
    TV, _ = emb_ref.shape          # vocab tile, embedding dim

    @pl.when(v_step == 0)
    def _init():
        acc_ref[...] = jnp.zeros_like(acc_ref)

    # --- fused gather + sum-pool: counts[b, v] = #{s : idx[b, s] == v} -------------
    # 2D counts tile built by a fully-unrolled loop over S (S is a static, small
    # constant here; equivalent to lax.fori_loop(..., unroll=True)).  Keeps only a
    # single (TB, TV) tile live instead of a (TB, S, TV) intermediate.
    # TODO(synk): for very long sequences / large vocabularies, a scalar-prefetch +
    # make_async_copy row gather (table left in HBM) beats this counts matmul.
    idx = idx_ref[...]                                                     # (TB, S) i32
    vocab_row = (jax.lax.broadcasted_iota(jnp.int32, (1, TV), 1)
                 + v_step * TV)                                            # (1, TV) i32
    counts = jnp.zeros((TB, TV), jnp.float32)
    for s in range(S):                                                     # unrolled
        counts = counts + (idx[:, s:s + 1] == vocab_row).astype(jnp.float32)

    # leaky_relu was already folded into the table in the wrapper; 1/S is deferred.
    acc_ref[...] += jnp.dot(counts.astype(emb_ref.dtype), emb_ref[...],
                            preferred_element_type=jnp.float32)            # (TB, E) f32

    # --- finalize on the last vocab tile: 1/S -> fc1 -> leaky_relu -> fc2 -> sigmoid
    @pl.when(v_step == pl.num_programs(1) - 1)
    def _finalize():
        pooled = acc_ref[...] * (1.0 / S)                                  # (TB, E) f32
        h = jnp.dot(pooled.astype(w1_ref.dtype), w1_ref[...],
                    preferred_element_type=jnp.float32) + b1_ref[...]
        h = _leaky_relu(h)                                                 # (TB, H) f32
        # fc2 as a VPU multiply + lane reduction (avoids an N=1 MXU matmul).
        logits = jnp.sum(h * w2_ref[...], axis=-1) + b2_ref[0, 0]          # (TB,)
        out_ref[...] = jax.nn.sigmoid(logits)[None, :].astype(out_ref.dtype)


def review_classifier(idx, emb, w1, b1, w2, b2, *, tile_b=None, tile_v=None,
                      compute_dtype=jnp.float32):
    """ReviewClassifier forward.  Linear weights are stored as (in, out).  Returns (B,)."""
    B, S = idx.shape
    V, E = emb.shape
    H = w1.shape[1]

    if tile_b is None:
        # Keep the whole (padded) batch in one tile when it fits so the embedding
        # table is streamed from HBM exactly once; fall back to 256-row tiles for
        # large batches (two MXU passes on v6e/v7x's 256x256, 2x128 on v5e).
        b_ceil8 = ((B + 7) // 8) * 8
        tile_b = b_ceil8 if b_ceil8 <= 512 else 256
    if tile_v is None:
        v_ceil8 = ((V + 7) // 8) * 8
        tile_v = min(v_ceil8, 4096)
    assert tile_b % 8 == 0 or tile_b == B
    assert tile_v % 8 == 0 or tile_v == V

    num_b = pl.cdiv(B, tile_b)
    num_v = pl.cdiv(V, tile_v)
    b_pad = num_b * tile_b
    v_pad = num_v * tile_v

    # Pad the token ids (token 0 rows) so no block ever reads out of bounds; padded
    # rows are sliced off the output below.
    idx_p = idx.astype(jnp.int32)
    if b_pad != B:
        idx_p = jnp.pad(idx_p, ((0, b_pad - B), (0, 0)))

    # leaky_relu commutes with the embedding gather, so fold it into the wrapper
    # cast/pad pass once instead of recomputing it per grid step inside the kernel.
    # MXU inputs in compute_dtype (bf16 halves HBM/VMEM bytes and doubles MXU rate on
    # v6e/v7x); accumulation stays f32 via preferred_element_type.
    emb_c = _leaky_relu(emb).astype(compute_dtype)
    if v_pad != V:
        emb_c = jnp.pad(emb_c, ((0, v_pad - V), (0, 0)))   # zero rows never match a token
    w1_c = w1.astype(compute_dtype)
    b1_r = b1.reshape(1, H).astype(jnp.float32)
    w2_r = w2.reshape(1, H).astype(jnp.float32)            # fc2 weight as lane-dense row
    b2_r = b2.reshape(1, 1).astype(jnp.float32)

    # TODO(synk): on v7x (2 TensorCores) with num_b == 1 the parallel axis is
    # degenerate; splitting the vocab reduction across cores would engage both TCs.
    out = pl.pallas_call(
        review_classifier_kernel,
        out_shape=jax.ShapeDtypeStruct((1, b_pad), jnp.float32),
        grid_spec=pltpu.PrefetchScalarGridSpec(
            num_scalar_prefetch=0,
            grid=(num_b, num_v),                            # reduction (vocab) axis last
            in_specs=[
                pl.BlockSpec((tile_b, S), lambda i, v: (i, 0)),      # token ids
                pl.BlockSpec((tile_v, E), lambda i, v: (v, 0)),      # activated emb tile
                pl.BlockSpec((E, H), lambda i, v: (0, 0)),           # fc1 weight
                pl.BlockSpec((1, H), lambda i, v: (0, 0)),           # fc1 bias
                pl.BlockSpec((1, H), lambda i, v: (0, 0)),           # fc2 weight row
                pl.BlockSpec(memory_space=pltpu.MemorySpace.SMEM),   # fc2 bias scalar
            ],
            out_specs=pl.BlockSpec((1, tile_b), lambda i, v: (0, i)),
            scratch_shapes=[pltpu.VMEM((tile_b, E), jnp.float32)],   # pooled accumulator
        ),
        compiler_params=pltpu.CompilerParams(
            dimension_semantics=("parallel", "arbitrary"),
            vmem_limit_bytes=48 * 1024 * 1024,   # fits v7x's 64 MiB; safe on v5e/v6e
        ),
    )(idx_p, emb_c, w1_c, b1_r, w2_r, b2_r)

    # torch .squeeze(): (B,) for B > 1 (for B == 1 torch returns a 0-d scalar).
    return out[0, :B]


if __name__ == "__main__":
    B, S, V = 2, 8, 64  # small batch / seq / vocab

    key = jax.random.PRNGKey(0)
    k_emb, k_w1, k_b1, k_w2, k_b2, k_idx = jax.random.split(key, 6)

    # nn.Embedding: N(0, 1)
    emb = jax.random.normal(k_emb, (V, EMBEDDING_DIM), jnp.float32)
    # nn.Linear: U(-1/sqrt(fan_in), 1/sqrt(fan_in)); stored as (in, out)
    lim1 = 1.0 / (EMBEDDING_DIM ** 0.5)
    w1 = jax.random.uniform(k_w1, (EMBEDDING_DIM, HIDDEN_DIM), jnp.float32, -lim1, lim1)
    b1 = jax.random.uniform(k_b1, (HIDDEN_DIM,), jnp.float32, -lim1, lim1)
    lim2 = 1.0 / (HIDDEN_DIM ** 0.5)
    w2 = jax.random.uniform(k_w2, (HIDDEN_DIM, 1), jnp.float32, -lim2, lim2)
    b2 = jax.random.uniform(k_b2, (1,), jnp.float32, -lim2, lim2)

    idx = jax.random.randint(k_idx, (B, S), 0, V, dtype=jnp.int32)

    # pure-JAX reference
    embedded = _leaky_relu(emb[idx])                         # (B, S, E)
    pooled = jnp.mean(embedded, axis=1)                      # (B, E)
    h = _leaky_relu(pooled @ w1 + b1[None, :])               # (B, H)
    ref = jax.nn.sigmoid(h @ w2 + b2[None, :]).squeeze(-1)   # (B,)

    # default tiling (single vocab tile)
    out_default = review_classifier(idx, emb, w1, b1, w2, b2)
    jax.block_until_ready(out_default)
    assert out_default.shape == (B,)
    assert jnp.allclose(out_default, ref, atol=1e-4, rtol=1e-4)

    # tile_v=32 -> 2 vocab reduction steps, exercising the accumulator / pipeline path.
    out = review_classifier(idx, emb, w1, b1, w2, b2, tile_v=32)
    jax.block_until_ready(out)
    assert out.shape == (B,)
    assert jnp.allclose(out, ref, atol=1e-4, rtol=1e-4)

    # bf16 MXU-input path (v6e/v7x throughput option): same kernel, looser tolerance.
    out_bf16 = review_classifier(idx, emb, w1, b1, w2, b2, tile_v=32,
                                 compute_dtype=jnp.bfloat16)
    jax.block_until_ready(out_bf16)
    assert jnp.allclose(out_bf16, ref, atol=3e-2, rtol=3e-2)

    print("KERNEL_OK")
</pallas_src>

<mosaic_0001>
module attributes {stable_mosaic.version = 11 : i64} {
  func.func @review_classifier_kernel(%arg0: i32, %arg1: i32, %arg2: memref<8x8xi32, #tpu.memory_space<vmem>>, %arg3: memref<64x256xf32, #tpu.memory_space<vmem>>, %arg4: memref<256x128xf32, #tpu.memory_space<vmem>>, %arg5: memref<1x128xf32, #tpu.memory_space<vmem>>, %arg6: memref<1x128xf32, #tpu.memory_space<vmem>>, %arg7: memref<1x1xf32, #tpu.memory_space<smem>>, %arg8: memref<1x8xf32, #tpu.memory_space<vmem>>, %arg9: memref<8x256xf32, #tpu.memory_space<vmem>>) attributes {dimension_semantics = [#tpu.dimension_semantics<parallel>, #tpu.dimension_semantics<arbitrary>], iteration_bounds = array<i64: 1, 1>, scalar_prefetch = 0 : i64, scratch_operands = 1 : i64, tpu.core_type = #tpu.core_type<tc>, window_params = [{transform_indices = @transform_0, window_bounds = array<i64: 8, 8>}, {transform_indices = @transform_1, window_bounds = array<i64: 64, 256>}, {pipeline_mode = #tpu.pipeline_mode<synchronous>, transform_indices = @transform_2, window_bounds = array<i64: 256, 128>}, {pipeline_mode = #tpu.pipeline_mode<synchronous>, transform_indices = @transform_3, window_bounds = array<i64: 1, 128>}, {pipeline_mode = #tpu.pipeline_mode<synchronous>, transform_indices = @transform_4, window_bounds = array<i64: 1, 128>}, {transform_indices = @transform_5, window_bounds = array<i64: 1, 1>}, {transform_indices = @transform_6, window_bounds = array<i64: 1, 8>}]} {
    %c0_i32 = arith.constant 0 : i32
    %0 = arith.cmpi eq, %arg1, %c0_i32 : i32
    %1 = arith.extui %0 : i1 to i32
    %c0_i32_0 = arith.constant 0 : i32
    %2 = arith.cmpi ne, %1, %c0_i32_0 : i32
    scf.if %2 {
      %cst_11 = arith.constant 0.000000e+00 : f32
      %73 = vector.broadcast %cst_11 : f32 to vector<8x256xf32>
      %c0_12 = arith.constant 0 : index
      %c0_13 = arith.constant 0 : index
      %74 = vector.load %arg9[%c0_12, %c0_13] : memref<8x256xf32, #tpu.memory_space<vmem>>, vector<8x256xf32>
      tpu.vector_store %arg9[%c0_12, %c0_13], %73 {strides = array<i32>} : memref<8x256xf32, #tpu.memory_space<vmem>>, vector<8x256xf32>,
    } else {
    }
    %c0 = arith.constant 0 : index
    %c0_1 = arith.constant 0 : index
    %3 = vector.load %arg2[%c0, %c0_1] : memref<8x8xi32, #tpu.memory_space<vmem>>, vector<8x8xi32>
    %4 = tpu.iota {dimensions = array<i32: 1>} : vector<1x64xi32>
    %c64_i32 = arith.constant 64 : i32
    %5 = arith.muli %arg1, %c64_i32 : i32
    %6 = vector.broadcast %5 : i32 to vector<1x64xi32>
    %7 = arith.addi %4, %6 : vector<1x64xi32>
    %cst = arith.constant 0.000000e+00 : f32
    %8 = vector.broadcast %cst : f32 to vector<8x64xf32>
    %9 = vector.extract_strided_slice %3 {offsets = [0, 0], sizes = [8, 1], strides = [1, 1]} : vector<8x8xi32> to vector<8x1xi32>
    %10 = vector.broadcast %9 : vector<8x1xi32> to vector<8x64xi32>
    %11 = vector.broadcast %7 : vector<1x64xi32> to vector<8x64xi32>
    %12 = arith.cmpi eq, %10, %11 : vector<8x64xi32>
    %13 = arith.extui %12 : vector<8x64xi1> to vector<8x64xi32>
    %14 = arith.sitofp %13 : vector<8x64xi32> to vector<8x64xf32>
    %15 = arith.addf %8, %14 : vector<8x64xf32>
    %16 = vector.extract_strided_slice %3 {offsets = [0, 1], sizes = [8, 1], strides = [1, 1]} : vector<8x8xi32> to vector<8x1xi32>
    %17 = vector.broadcast %16 : vector<8x1xi32> to vector<8x64xi32>
    %18 = vector.broadcast %7 : vector<1x64xi32> to vector<8x64xi32>
    %19 = arith.cmpi eq, %17, %18 : vector<8x64xi32>
    %20 = arith.extui %19 : vector<8x64xi1> to vector<8x64xi32>
    %21 = arith.sitofp %20 : vector<8x64xi32> to vector<8x64xf32>
    %22 = arith.addf %15, %21 : vector<8x64xf32>
    %23 = vector.extract_strided_slice %3 {offsets = [0, 2], sizes = [8, 1], strides = [1, 1]} : vector<8x8xi32> to vector<8x1xi32>
    %24 = vector.broadcast %23 : vector<8x1xi32> to vector<8x64xi32>
    %25 = vector.broadcast %7 : vector<1x64xi32> to vector<8x64xi32>
    %26 = arith.cmpi eq, %24, %25 : vector<8x64xi32>
    %27 = arith.extui %26 : vector<8x64xi1> to vector<8x64xi32>
    %28 = arith.sitofp %27 : vector<8x64xi32> to vector<8x64xf32>
    %29 = arith.addf %22, %28 : vector<8x64xf32>
    %30 = vector.extract_strided_slice %3 {offsets = [0, 3], sizes = [8, 1], strides = [1, 1]} : vector<8x8xi32> to vector<8x1xi32>
    %31 = vector.broadcast %30 : vector<8x1xi32> to vector<8x64xi32>
    %32 = vector.broadcast %7 : vector<1x64xi32> to vector<8x64xi32>
    %33 = arith.cmpi eq, %31, %32 : vector<8x64xi32>
    %34 = arith.extui %33 : vector<8x64xi1> to vector<8x64xi32>
    %35 = arith.sitofp %34 : vector<8x64xi32> to vector<8x64xf32>
    %36 = arith.addf %29, %35 : vector<8x64xf32>
    %37 = vector.extract_strided_slice %3 {offsets = [0, 4], sizes = [8, 1], strides = [1, 1]} : vector<8x8xi32> to vector<8x1xi32>
    %38 = vector.broadcast %37 : vector<8x1xi32> to vector<8x64xi32>
    %39 = vector.broadcast %7 : vector<1x64xi32> to vector<8x64xi32>
    %40 = arith.cmpi eq, %38, %39 : vector<8x64xi32>
    %41 = arith.extui %40 : vector<8x64xi1> to vector<8x64xi32>
    %42 = arith.sitofp %41 : vector<8x64xi32> to vector<8x64xf32>
    %43 = arith.addf %36, %42 : vector<8x64xf32>
    %44 = vector.extract_strided_slice %3 {offsets = [0, 5], sizes = [8, 1], strides = [1, 1]} : vector<8x8xi32> to vector<8x1xi32>
    %45 = vector.broadcast %44 : vector<8x1xi32> to vector<8x64xi32>
    %46 = vector.broadcast %7 : vector<1x64xi32> to vector<8x64xi32>
    %47 = arith.cmpi eq, %45, %46 : vector<8x64xi32>
    %48 = arith.extui %47 : vector<8x64xi1> to vector<8x64xi32>
    %49 = arith.sitofp %48 : vector<8x64xi32> to vector<8x64xf32>
    %50 = arith.addf %43, %49 : vector<8x64xf32>
    %51 = vector.extract_strided_slice %3 {offsets = [0, 6], sizes = [8, 1], strides = [1, 1]} : vector<8x8xi32> to vector<8x1xi32>
    %52 = vector.broadcast %51 : vector<8x1xi32> to vector<8x64xi32>
    %53 = vector.broadcast %7 : vector<1x64xi32> to vector<8x64xi32>
    %54 = arith.cmpi eq, %52, %53 : vector<8x64xi32>
    %55 = arith.extui %54 : vector<8x64xi1> to vector<8x64xi32>
    %56 = arith.sitofp %55 : vector<8x64xi32> to vector<8x64xf32>
    %57 = arith.addf %50, %56 : vector<8x64xf32>
    %58 = vector.extract_strided_slice %3 {offsets = [0, 7], sizes = [8, 1], strides = [1, 1]} : vector<8x8xi32> to vector<8x1xi32>
    %59 = vector.broadcast %58 : vector<8x1xi32> to vector<8x64xi32>
    %60 = vector.broadcast %7 : vector<1x64xi32> to vector<8x64xi32>
    %61 = arith.cmpi eq, %59, %60 : vector<8x64xi32>
    %62 = arith.extui %61 : vector<8x64xi1> to vector<8x64xi32>
    %63 = arith.sitofp %62 : vector<8x64xi32> to vector<8x64xf32>
    %64 = arith.addf %57, %63 : vector<8x64xf32>
    %c0_2 = arith.constant 0 : index
    %c0_3 = arith.constant 0 : index
    %65 = vector.load %arg9[%c0_2, %c0_3] : memref<8x256xf32, #tpu.memory_space<vmem>>, vector<8x256xf32>
    %c0_4 = arith.constant 0 : index
    %c0_5 = arith.constant 0 : index
    %66 = vector.load %arg3[%c0_4, %c0_5] : memref<64x256xf32, #tpu.memory_space<vmem>>, vector<64x256xf32>
    %cst_6 = arith.constant dense<0.000000e+00> : vector<8x256xf32>
    %67 = tpu.matmul %64, %66, %cst_6 {dimension_numbers = #tpu.dot_dimension_numbers<[1], [0], [0], [1], [0, 0, 1, 1], [], []>} : vector<8x64xf32>, vector<64x256xf32>, vector<8x256xf32> -> vector<8x256xf32>
    %68 = arith.addf %65, %67 : vector<8x256xf32>
    %c0_7 = arith.constant 0 : index
    %c0_8 = arith.constant 0 : index
    %69 = vector.load %arg9[%c0_7, %c0_8] : memref<8x256xf32, #tpu.memory_space<vmem>>, vector<8x256xf32>
    tpu.vector_store %arg9[%c0_7, %c0_8], %68 {strides = array<i32>} : memref<8x256xf32, #tpu.memory_space<vmem>>, vector<8x256xf32>,
    %c0_i32_9 = arith.constant 0 : i32
    %70 = arith.cmpi eq, %arg1, %c0_i32_9 : i32
    %71 = arith.extui %70 : i1 to i32
    %c0_i32_10 = arith.constant 0 : i32
    %72 = arith.cmpi ne, %71, %c0_i32_10 : i32
    scf.if %72 {
      %c0_11 = arith.constant 0 : index
      %c0_12 = arith.constant 0 : index
      %73 = vector.load %arg9[%c0_11, %c0_12] : memref<8x256xf32, #tpu.memory_space<vmem>>, vector<8x256xf32>
      %cst_13 = arith.constant 1.250000e-01 : f32
      %74 = vector.broadcast %cst_13 : f32 to vector<8x256xf32>
      %75 = arith.mulf %73, %74 : vector<8x256xf32>
      %c0_14 = arith.constant 0 : index
      %c0_15 = arith.constant 0 : index
      %76 = vector.load %arg4[%c0_14, %c0_15] : memref<256x128xf32, #tpu.memory_space<vmem>>, vector<256x128xf32>
      %cst_16 = arith.constant dense<0.000000e+00> : vector<8x128xf32>
      %77 = tpu.matmul %75, %76, %cst_16 {dimension_numbers = #tpu.dot_dimension_numbers<[1], [0], [0], [1], [0, 0, 1, 1], [], []>} : vector<8x256xf32>, vector<256x128xf32>, vector<8x128xf32> -> vector<8x128xf32>
      %c0_17 = arith.constant 0 : index
      %c0_18 = arith.constant 0 : index
      %78 = vector.load %arg5[%c0_17, %c0_18] : memref<1x128xf32, #tpu.memory_space<vmem>>, vector<1x128xf32>
      %79 = vector.broadcast %78 : vector<1x128xf32> to vector<8x128xf32>
      %80 = arith.addf %77, %79 : vector<8x128xf32>
      %cst_19 = arith.constant 0.000000e+00 : f32
      %81 = vector.broadcast %cst_19 : f32 to vector<8x128xf32>
      %82 = arith.cmpf oge, %80, %81 : vector<8x128xf32>
      %cst_20 = arith.constant 0.00999999977 : f32
      %83 = vector.broadcast %cst_20 : f32 to vector<8x128xf32>
      %84 = arith.mulf %83, %80 : vector<8x128xf32>
      %85 = arith.select %82, %80, %84 : vector<8x128xi1>, vector<8x128xf32>
      %c0_21 = arith.constant 0 : index
      %c0_22 = arith.constant 0 : index
      %86 = vector.load %arg6[%c0_21, %c0_22] : memref<1x128xf32, #tpu.memory_space<vmem>>, vector<1x128xf32>
      %87 = vector.broadcast %86 : vector<1x128xf32> to vector<8x128xf32>
      %88 = arith.mulf %85, %87 : vector<8x128xf32>
      %cst_23 = arith.constant dense<0.000000e+00> : vector<8xf32>
      %89 = vector.multi_reduction <add>, %88, %cst_23 [1] : vector<8x128xf32> to vector<8xf32>
      %c0_24 = arith.constant 0 : index
      %c0_25 = arith.constant 0 : index
      %90 = memref.load %arg7[%c0_24, %c0_25] : memref<1x1xf32, #tpu.memory_space<smem>>
      %91 = vector.broadcast %90 : f32 to vector<8xf32>
      %92 = arith.addf %89, %91 : vector<8xf32>
      %93 = arith.negf %92 : vector<8xf32>
      %94 = math.exp %93 : vector<8xf32>
      %cst_26 = arith.constant 1.000000e+00 : f32
      %95 = vector.broadcast %cst_26 : f32 to vector<8xf32>
      %96 = arith.addf %95, %94 : vector<8xf32>
      %97 = arith.divf %95, %96 : vector<8xf32>
      %98 = vector.shape_cast %97 : vector<8xf32> to vector<1x8xf32>
      %c0_27 = arith.constant 0 : index
      %c0_28 = arith.constant 0 : index
      %99 = vector.load %arg8[%c0_27, %c0_28] : memref<1x8xf32, #tpu.memory_space<vmem>>, vector<1x8xf32>
      tpu.vector_store %arg8[%c0_27, %c0_28], %98 {strides = array<i32>} : memref<1x8xf32, #tpu.memory_space<vmem>>, vector<1x8xf32>,
    } else {
    }
    return
  }
  func.func @transform_0(%arg0: i32, %arg1: i32) -> (i32, i32) {
    %c0_i32 = arith.constant 0 : i32
    %c0_i32_0 = arith.constant 0 : i32
    return %arg0, %c0_i32 : i32, i32
  }
  func.func @transform_1(%arg0: i32, %arg1: i32) -> (i32, i32) {
    %c0_i32 = arith.constant 0 : i32
    %c0_i32_0 = arith.constant 0 : i32
    return %arg1, %c0_i32 : i32, i32
  }
  func.func @transform_2(%arg0: i32, %arg1: i32) -> (i32, i32) {
    %c0_i32 = arith.constant 0 : i32
    %c0_i32_0 = arith.constant 0 : i32
    %c0_i32_1 = arith.constant 0 : i32
    return %c0_i32, %c0_i32_0 : i32, i32
  }
  func.func @transform_3(%arg0: i32, %arg1: i32) -> (i32, i32) {
    %c0_i32 = arith.constant 0 : i32
    %c0_i32_0 = arith.constant 0 : i32
    %c0_i32_1 = arith.constant 0 : i32
    return %c0_i32, %c0_i32_0 : i32, i32
  }
  func.func @transform_4(%arg0: i32, %arg1: i32) -> (i32, i32) {
    %c0_i32 = arith.constant 0 : i32
    %c0_i32_0 = arith.constant 0 : i32
    %c0_i32_1 = arith.constant 0 : i32
    return %c0_i32, %c0_i32_0 : i32, i32
  }
  func.func @transform_5(%arg0: i32, %arg1: i32) -> (i32, i32) {
    %c0_i32 = arith.constant 0 : i32
    %c0_i32_0 = arith.constant 0 : i32
    %c0_i32_1 = arith.constant 0 : i32
    return %c0_i32, %c0_i32_0 : i32, i32
  }
  func.func @transform_6(%arg0: i32, %arg1: i32) -> (i32, i32) {
    %c0_i32 = arith.constant 0 : i32
    %c0_i32_0 = arith.constant 0 : i32
    return %c0_i32, %arg0 : i32, i32
  }
}

</mosaic_0001>

<bundles_post_ra>
// kernel: tpu_custom_call.1
= control target key start
LH: loop header
LB: loop body
LE: loop exit
PB: predicated region body
PF: predicated region fallthrough
CT: control target
= control target key end

     0   :  { %12 = vsyncpa [#allocation5], 0  ;;  %s741_s0 = inlined_call_operand.hbm [shape: s32[8,8], index: 0, kind: input, shape index: {}]   ;;  %s742_s1 = inlined_call_operand.hbm [shape: f32[64,256], index: 1, kind: input, shape index: {}]   ;;  %s743_s2 = inlined_call_operand.hbm [shape: f32[256,128], index: 2, kind: input, shape index: {}]   ;;  %s744_s3 = inlined_call_operand.vmem [shape: f32[1,128], index: 3, kind: input, shape index: {}]   ;;  %s745_s4 = inlined_call_operand.vmem [shape: f32[1,128], index: 4, kind: input, shape index: {}]   ;;  %s746_s5 = inlined_call_operand.<no memory space> [shape: f32[1,1], index: 5, kind: input, shape index: {}]   ;;  %s747_s6 = inlined_call_operand.hbm [shape: f32[1,8], index: 6, kind: output, shape index: {}]  }
   0x1   :  { %13 = vsyncpa [#allocation8], 0 }
   0x2   :  { %14 = vsyncpa [#allocation6], 0  ;;  %s610_s21 = smov [#allocation7]   ;;  %s516_s25 = scalar_lea.hbm %s742_s1, 2048 }
   0x3   :  { %s30_s22 = sshll.u32 %s610_s21, 4  ;;  %p517_p0 = scmp.ne.s32.totalorder %s742_s1, %s516_s25  ;;  %s31_s22 = int_to_ptr.vmem [resolvable:$true] %s30_s22 }
   0x4   :  { %p520_p1 = scmp.lt.u32.totalorder %s516_s25, %s742_s1 }
   0x6   :  { %p522_p2 = pnand %p520_p1, %p517_p0 }
   0x8   :  { %525 = shalt.err (!%p522_p2)
}
   0x9   :  { %s526_s30 = scalar_lea.vmem %s31_s22, 2048  ;;  %p531_p4 = scmp.lt.s32.totalorder %s31_s22, %s31_s22 }
   0xa   :  { %p527_p3 = scmp.ne.s32.totalorder %s31_s22, %s526_s30  ;;  %p532_p5 = scmp.lt.s32.totalorder %s526_s30, %s526_s30 }
   0xc   :  { %p533_p6 = por %p532_p5, %p531_p4 }
   0xe   :  { %p534_p7 = pnand %p533_p6, %p527_p3 }
  0x10   :  { %537 = shalt.err (!%p534_p7)
}
  0x11   :  { %s611_s7 = smov 256   ;;  %s612_s8 = smov 16  }
  0x12   :  { %36 = dma.hbm_to_vmem [thread:$0]  %s742_s1, 2048, %s31_s22, [#allocation8], %s611_s7, %s611_s7, %s612_s8  }
  0x13   :  { %s613_s11 = smov [#allocation4]   ;;  %s614_s13 = smov [#allocation9]  }
  0x14   :  { %s21_s12 = sshll.u32 %s613_s11, 4  ;;  %s42_s14 = sshll.u32 %s614_s13, 4  ;;  %s22_s12 = int_to_ptr.vmem [resolvable:$true] %s21_s12  ;;  %s43_s14 = int_to_ptr.vmem [resolvable:$true] %s42_s14 }
  0x15   :  { %s538_s17 = scalar_lea.hbm %s741_s0, 128 }
  0x16   :  { %p539_p8 = scmp.ne.s32.totalorder %s741_s0, %s538_s17  ;;  %p542_p9 = scmp.lt.u32.totalorder %s538_s17, %s741_s0 }
  0x18   :  { %p544_p10 = pnand %p542_p9, %p539_p8 }
  0x1a   :  { %547 = shalt.err (!%p544_p10)
}
  0x1b   :  { %s548_s1 = scalar_lea.vmem %s22_s12, 128  ;;  %p553_p12 = scmp.lt.s32.totalorder %s22_s12, %s22_s12 }
  0x1c   :  { %p549_p11 = scmp.ne.s32.totalorder %s22_s12, %s548_s1  ;;  %p554_p13 = scmp.lt.s32.totalorder %s548_s1, %s548_s1 }
  0x1e   :  { %p555_p0 = por %p554_p13, %p553_p12 }
  0x20   :  { %p556_p1 = pnand %p555_p0, %p549_p11 }
  0x22   :  { %559 = shalt.err (!%p556_p1)
}
  0x23   :  { %24 = dma.hbm_to_vmem [thread:$0]  %s741_s0, 128, %s22_s12, [#allocation5]  }
  0x24   :  { %s560_s26 = scalar_lea.hbm %s743_s2, 4096 }
  0x25   :  { %p561_p2 = scmp.ne.s32.totalorder %s743_s2, %s560_s26  ;;  %p564_p3 = scmp.lt.u32.totalorder %s560_s26, %s743_s2 }
  0x27   :  { %p566_p4 = pnand %p564_p3, %p561_p2 }
  0x29   :  { %569 = shalt.err (!%p566_p4)
}
  0x2a   :  { %s570_s7 = scalar_lea.vmem %s43_s14, 4096  ;;  %p575_p6 = scmp.lt.s32.totalorder %s43_s14, %s43_s14 }
  0x2b   :  { %p571_p5 = scmp.ne.s32.totalorder %s43_s14, %s570_s7  ;;  %p576_p7 = scmp.lt.s32.totalorder %s570_s7, %s570_s7 }
  0x2d   :  { %p577_p8 = por %p576_p7, %p575_p6 }
  0x2f   :  { %p578_p9 = pnand %p577_p8, %p571_p5 }
  0x31   :  { %581 = shalt.err (!%p578_p9)
}
  0x32   :  { %s615_s0 = smov 128   ;;  %s616_s8 = smov 8  }
  0x33   :  { %48 = dma.hbm_to_vmem [thread:$0]  %s743_s2, 4096, %s43_s14, [#allocation8], %s615_s0, %s615_s0, %s616_s8  }
  0x34   :  { %604 = dma.done.wait [#allocation5], 128  }
  0x35   :  { %605 = vsyncadd [#allocation5], 4294967168 }
  0x36   :  { %606 = dma.done.wait [#allocation8], 6144  }
  0x37   :  { %607 = vsyncadd [#allocation8], 4294961152  ;;  %v617_v0 = vmov 2   ;;  %v618_v1 = vmov 0   ;;  %v619_v2 = vmov 0.0   ;;  %v70_v3 = vld [vmem:[#allocation4] sm:$0xff] }
  0x38   :  { %505 = vset.pattern.permute.xlu1 %v617_v0  ;;  %503 = vset.pattern.permute.xlu0 %v618_v1  ;;  %v620_v4 = vmov 3   ;;  %v621_v5 = vmov 1   ;;  %v135_v6 = vld [vmem:[#allocation7 + $0x8] sm:$0xff]  ;;  %v137_v7 = vld [vmem:[#allocation7 + $0x18] sm:$0xff]  ;;  %v134_v9 = vld [vmem:[#allocation7] sm:$0xff]  ;;  %v622_v12 = vmov 4  }
  0x39   :  { %218 = vmatprep.mubr.f32.mxu0 %v619_v2  ;;  %91 = vperm.xlu1 %505, %v70_v3   ;;  %v438_v8 = vpack.c.bf16 %v137_v7, %v135_v6  ;;  %v136_v10 = vld [vmem:[#allocation7 + $0x10] sm:$0xff]  ;;  %v623_v13 = vmov 5   ;;  %v139_v14 = vld [vmem:[#allocation7 + $0x28] sm:$0xff]  ;;  %v141_v15 = vld [vmem:[#allocation7 + $0x38] sm:$0xff]  ;;  %v624_v22 = vmov 6   ;;  %v625_v26 = vmov 7  }
  0x3a   :  { %77 = vperm.xlu0 %503, %v70_v3   ;;  %v440_v11 = vpack.c.bf16 %v136_v10, %v134_v9  ;;  %v442_v16 = vpack.c.bf16 %v141_v15, %v139_v14  ;;  %v138_v17 = vld [vmem:[#allocation7 + $0x20] sm:$0xff]  ;;  %v140_v18 = vld [vmem:[#allocation7 + $0x30] sm:$0xff]  ;;  %v143_v20 = vld [vmem:[#allocation7 + $0x48] sm:$0xff]  ;;  %vm150_vm8 = vcmask 523264   ;;  %vm373_vm10 = vcmask 57344  }
  0x3b   :  { %439 = vmatprep.subr.bf16.mxu0 %v438_v8  ;;  %v444_v19 = vpack.c.bf16 %v140_v18, %v138_v17  ;;  %v145_v21 = vld [vmem:[#allocation7 + $0x58] sm:$0xff]  ;;  %v142_v24 = vld [vmem:[#allocation7 + $0x40] sm:$0xff]  ;;  %v144_v25 = vld [vmem:[#allocation7 + $0x50] sm:$0xff] }
  0x3c   :  { %441 = vmatpush1.bf16.msra.mxu0 %v440_v11  ;;  %v446_v23 = vpack.c.bf16 %v145_v21, %v143_v20  ;;  %v448_v27 = vpack.c.bf16 %v144_v25, %v142_v24  ;;  %v147_v28 = vld [vmem:[#allocation7 + $0x68] sm:$0xff]  ;;  %v149_v29 = vld [vmem:[#allocation7 + $0x78] sm:$0xff]  ;;  %v146_v31 = vld [vmem:[#allocation7 + $0x60] sm:$0xff] }
  0x3d   :  { %506 = vset.pattern.permute.xlu1 %v620_v4  ;;  %443 = vmatprep.subr.bf16.mxu0 %v442_v16  ;;  %v450_v30 = vpack.c.bf16 %v149_v29, %v147_v28  ;;  %v148_v32 = vld [vmem:[#allocation7 + $0x70] sm:$0xff]  ;;  %v252_v34 = vld [vmem:[#allocation9 + $0x80] sm:$0xff]  ;;  %v253_v35 = vld [vmem:[#allocation9 + $0x88] sm:$0xff] }
  0x3e   :  { %504 = vset.pattern.permute.xlu0 %v621_v5  ;;  %98 = vperm.xlu1 %506, %v70_v3   ;;  %v452_v33 = vpack.c.bf16 %v148_v32, %v146_v31  ;;  %v236_v36 = vld [vmem:[#allocation9] sm:$0xff]  ;;  %v454_v37 = vpack.c.bf16 %v253_v35, %v252_v34  ;;  %v237_v38 = vld [vmem:[#allocation9 + $0x8] sm:$0xff]  ;;  %v254_v39 = vld [vmem:[#allocation9 + $0x90] sm:$0xff] }
  0x3f   :  { %84 = vperm.xlu0 %504, %v70_v3   ;;  %v255_v40 = vld [vmem:[#allocation9 + $0x98] sm:$0xff]  ;;  %v456_v41 = vpack.c.bf16 %v237_v38, %v236_v36  ;;  %v238_v43 = vld [vmem:[#allocation9 + $0x10] sm:$0xff]  ;;  %v256_v45 = vld [vmem:[#allocation9 + $0xa0] sm:$0xff] }
  0x40   :  { %445 = vmatpush1.bf16.msra.mxu0 %v444_v19  ;;  %v458_v42 = vpack.c.bf16 %v255_v40, %v254_v39  ;;  %v239_v44 = vld [vmem:[#allocation9 + $0x18] sm:$0xff]  ;;  %455 = vmatprep.subr.bf16.mxu1 %v454_v37  ;;  %v257_v46 = vld [vmem:[#allocation9 + $0xa8] sm:$0xff]  ;;  %v240_v49 = vld [vmem:[#allocation9 + $0x20] sm:$0xff] }
  0x41   :  { %447 = vmatprep.subr.bf16.mxu0 %v446_v23  ;;  %457 = vmatpush3.bf16.msra.mxu1 %v456_v41  ;;  %v460_v47 = vpack.c.bf16 %v239_v44, %v238_v43  ;;  %v462_v48 = vpack.c.bf16 %v257_v46, %v256_v45  ;;  %v241_v50 = vld [vmem:[#allocation9 + $0x28] sm:$0xff]  ;;  %v258_v51 = vld [vmem:[#allocation9 + $0xb0] sm:$0xff]  ;;  %v259_v52 = vld [vmem:[#allocation9 + $0xb8] sm:$0xff] }
  0x42   :  { %507 = vset.pattern.permute.xlu1 %v622_v12  ;;  %459 = vmatprep.subr.bf16.mxu1 %v458_v42  ;;  %v464_v53 = vpack.c.bf16 %v241_v50, %v240_v49  ;;  %v466_v54 = vpack.c.bf16 %v259_v52, %v258_v51  ;;  %v242_v55 = vld [vmem:[#allocation9 + $0x30] sm:$0xff]  ;;  %v243_v56 = vld [vmem:[#allocation9 + $0x38] sm:$0xff]  ;;  %v260_v57 = vld [vmem:[#allocation9 + $0xc0] sm:$0xff] }
  0x43   :  { %508 = vset.pattern.permute.xlu0 %v623_v13  ;;  %105 = vperm.xlu1 %507, %v70_v3   ;;  %v261_v58 = vld [vmem:[#allocation9 + $0xc8] sm:$0xff]  ;;  %v468_v59 = vpack.c.bf16 %v243_v56, %v242_v55  ;;  %v244_v61 = vld [vmem:[#allocation9 + $0x40] sm:$0xff]  ;;  %v262_v63 = vld [vmem:[#allocation9 + $0xd0] sm:$0xff]  ;;  %v71_v13 = vlaneseq  ;;  %v359_v56 = vstv %s746_s5 }
  0x44   :  { %112 = vperm.xlu0 %508, %v70_v3   ;;  %449 = vmatpush1.bf16.msra.mxu0 %v448_v27  ;;  %v470_v60 = vpack.c.bf16 %v261_v58, %v260_v57  ;;  %v245_v62 = vld [vmem:[#allocation9 + $0x48] sm:$0xff]  ;;  %v263_v0 = vld [vmem:[#allocation9 + $0xd8] sm:$0xff]  ;;  %v246_v4 = vld [vmem:[#allocation9 + $0x50] sm:$0xff] }
  0x45   :  { %451 = vmatprep.subr.bf16.mxu0 %v450_v30  ;;  %461 = vmatpush3.bf16.msra.mxu1 %v460_v47  ;;  %v472_v1 = vpack.c.bf16 %v245_v62, %v244_v61  ;;  %v247_v5 = vld [vmem:[#allocation9 + $0x58] sm:$0xff]  ;;  %v264_v6 = vld [vmem:[#allocation9 + $0xe0] sm:$0xff]  ;;  %v265_v7 = vld [vmem:[#allocation9 + $0xe8] sm:$0xff]  ;;  %v700_v16 = vand.u32 127, %v71_v13  ;;  %v369_v62 = vshrl.u32 %v71_v13, 7 }
  0x46   :  { %463 = vmatprep.subr.bf16.mxu1 %v462_v48  ;;  %v476_v8 = vpack.c.bf16 %v247_v5, %v246_v4  ;;  %v478_v9 = vpack.c.bf16 %v265_v7, %v264_v6  ;;  %v248_v10 = vld [vmem:[#allocation9 + $0x60] sm:$0xff]  ;;  %v249_v11 = vld [vmem:[#allocation9 + $0x68] sm:$0xff]  ;;  %v266_v38 = vld [vmem:[#allocation9 + $0xf0] sm:$0xff] }
  0x47   :  { %509 = vset.pattern.permute.xlu1 %v624_v22  ;;  %v480_v12 = vpack.c.bf16 %v249_v11, %v248_v10  ;;  %v267_v39 = vld [vmem:[#allocation9 + $0xf8] sm:$0xff]  ;;  %v250_v41 = vld [vmem:[#allocation9 + $0x70] sm:$0xff] }
  0x48   :  { %511 = vset.pattern.permute.xlu0 %v625_v26  ;;  %119 = vperm.xlu1 %509, %v70_v3   ;;  %v482_v40 = vpack.c.bf16 %v267_v39, %v266_v38  ;;  %v251_v42 = vld [vmem:[#allocation9 + $0x78] sm:$0xff] }
  0x49   :  { %453 = vmatpush1.bf16.msra.mxu0 %v452_v33  ;;  %465 = vmatpush3.bf16.msra.mxu1 %v464_v53  ;;  %v484_v43 = vpack.c.bf16 %v251_v42, %v250_v41  ;;  %v401_v53 = vld [vmem:[%s745_s4] ss:$0 sm:$0xff] }
  0x4a   :  { %467 = vmatprep.subr.bf16.mxu1 %v466_v54 }
  0x4c   :  { %510 = vset.pattern.permute.xlu1 %v625_v26 }
  0x4d   :  { %126 = vperm.xlu1 %510, %v70_v3   ;;  %469 = vmatpush3.bf16.msra.mxu1 %v468_v59  ;;  %v474_v3 = vpack.c.bf16 %v263_v0, %v262_v63  ;;  %v370_v63 = vsub.s32 %v700_v16, %v369_v62 }
  0x4e   :  { %471 = vmatprep.subr.bf16.mxu1 %v470_v60 }
  0x51   :  { %473 = vmatpush3.bf16.msra.mxu1 %v472_v1 }
  0x52   :  { %475 = vmatprep.subr.bf16.mxu1 %v474_v3 }
  0x55   :  { %477 = vmatpush3.bf16.msra.mxu1 %v476_v8 }
  0x56   :  { %479 = vmatprep.subr.bf16.mxu1 %v478_v9 }
  0x59   :  { %481 = vmatpush3.bf16.msra.mxu1 %v480_v12 }
  0x5a   :  { %483 = vmatprep.subr.bf16.mxu1 %v482_v40 }
  0x5d   :  { %485 = vmatpush3.bf16.msra.mxu1 %v484_v43 }
  0xb8   :  { %v92_v14 = vpop.permute.xlu1 %91 }
  0xb9   :  { %v78_v15 = vpop.permute.xlu0 %77  ;;  %vm93_vm1 = vcmp.eq.s32.totalorder %v92_v14, %v700_v16 }
  0xba   :  { %vm79_vm0 = vcmp.eq.s32.totalorder %v78_v15, %v700_v16  ;;  %v393_v22 = vsel %vm93_vm1, 1.0, %v619_v2 }
  0xbb   :  { %v391_v19 = vsel %vm79_vm0, 1.0, %v619_v2 }
  0xbd   :  { %v99_v17 = vpop.permute.xlu1 %98 }
  0xbe   :  { %v85_v18 = vpop.permute.xlu0 %84  ;;  %vm100_vm3 = vcmp.eq.s32.totalorder %v99_v17, %v700_v16 }
  0xbf   :  { %vm86_vm2 = vcmp.eq.s32.totalorder %v85_v18, %v700_v16  ;;  %v394_v26 = vsel %vm100_vm3, 1.0, %v619_v2 }
  0xc0   :  { %v392_v20 = vsel %vm86_vm2, 1.0, %v619_v2 }
  0xc1   :  { %v89_v21 = vadd.f32 %v392_v20, %v391_v19 }
  0xc2   :  { %v106_v24 = vpop.permute.xlu1 %105 }
  0xc3   :  { %v96_v23 = vadd.f32 %v393_v22, %v89_v21  ;;  %v113_v25 = vpop.permute.xlu0 %112  ;;  %vm107_vm4 = vcmp.eq.s32.totalorder %v106_v24, %v700_v16 }
  0xc4   :  { %vm114_vm5 = vcmp.eq.s32.totalorder %v113_v25, %v700_v16  ;;  %v395_v28 = vsel %vm107_vm4, 1.0, %v619_v2 }
  0xc5   :  { %v103_v27 = vadd.f32 %v394_v26, %v96_v23  ;;  %v396_v30 = vsel %vm114_vm5, 1.0, %v619_v2 }
  0xc7   :  { %v110_v29 = vadd.f32 %v395_v28, %v103_v27  ;;  %v120_v31 = vpop.permute.xlu1 %119 }
  0xc8   :  { %vm121_vm6 = vcmp.eq.s32.totalorder %v120_v31, %v700_v16 }
  0xc9   :  { %v117_v32 = vadd.f32 %v396_v30, %v110_v29  ;;  %v397_v33 = vsel %vm121_vm6, 1.0, %v619_v2 }
  0xcb   :  { %v124_v35 = vadd.f32 %v397_v33, %v117_v32 }
  0xcc   :  { %v127_v34 = vpop.permute.xlu1 %126 }
  0xcd   :  { %vm128_vm7 = vcmp.eq.s32.totalorder %v127_v34, %v700_v16 }
  0xce   :  { %v398_v36 = vsel %vm128_vm7, 1.0, %v619_v2  ;;  %v400_v2 = vld [vmem:[%s744_s3] ss:$0 sm:$0xff]  ;;  %s626_s3 = smov [#allocation10]  }
  0xcf   :  { %v131_v37 = vadd.f32 %v398_v36, %v124_v35  ;;  %s381_s4 = sshll.u32 %s626_s3, 4  ;;  %s382_s4 = int_to_ptr.vmem [resolvable:$true] %s381_s4 }
  0xd0   :  { %s582_s16 = scalar_lea.vmem %s382_s4, 16  ;;  %s586_s5 = scalar_lea.vmem %s382_s4, 32 }
  0xd1   :  { %399 = vmatmul.mubr.msk.f32.vlgmr.msra.gmra.mrb[0].mxu0 %vm150_vm8, %v131_v37  ;;  %p583_p10 = scmp.ne.s32.totalorder %s382_s4, %s582_s16  ;;  %p587_p11 = scmp.lt.s32.totalorder %s382_s4, %s382_s4 }
  0xd2   :  { %p588_p12 = scmp.lt.s32.totalorder %s586_s5, %s582_s16 }
  0xd4   :  { %p589_p13 = por %p588_p12, %p587_p11 }
  0xd6   :  { %p590_p0 = pnand %p589_p13, %p583_p10 }
 0x1a4   :  { %v220_v44 = vpop.f32.mrb[0].mxu0 }
 0x1a5   :  { %v222_v45 = vpop.f32.mrb[1].mxu0  ;;  %v234_v47 = vmul.f32 0.125, %v220_v44 }
 0x1a6   :  { %v235_v46 = vmul.f32 0.125, %v222_v45 }
 0x1a8   :  { %339 = vmatprep.mubr.f32.mxu1 %v235_v46 }
 0x1a9   :  { %340 = vmatmul.mubr.f32.vlgmr.msra.gmra.mrb[0].mxu1 %v234_v47 }
 0x27c   :  { %v435_v48 = vpop.f32.mrb[0].mxu1 }
 0x27d   :  { %v436_v49 = vpop.f32.mrb[1].mxu1 }
 0x27e   :  { %v437_v50 = vadd.f32 %v436_v49, %v435_v48 }
 0x280   :  { %v342_v51 = vadd.f32 %v437_v50, %v400_v2 }
 0x282   :  { %vm345_vm9 = vcmp.ge.f32.partialorder %v342_v51, 0.0  ;;  %v346_v52 = vmul.f32 0.01, %v342_v51 }
 0x284   :  { %v347_v54 = vsel %vm345_vm9, %v342_v51, %v346_v52 }
 0x285   :  { %v355_v55 = vmul.f32 %v401_v53, %v347_v54 }
 0x287   :  { %356 = vadd.xlane.f32.xlu0 %v355_v55 }
 0x314   :  { %v357_v57 = vpop.xlane.xlu0 %356 }
 0x315   :  { %v360_v58 = vadd.f32 %v359_v56, %v357_v57 }
 0x317   :  { %v402_v59 = vmul.f32 -1.442695, %v360_v58 }
 0x319   :  { %512 = vpow2.f32 %v402_v59 }
 0x323   :  { %v513_v60 = vpop.eup %512 }
 0x324   :  { %v364_v61 = vadd.f32 1.0, %v513_v60 }
 0x326   :  { %514 = vrcp.f32 %v364_v61 }
 0x330   :  { %v515_v0 = vpop.eup %514 }
 0x331   :  { %v371_v1 = vrot.slane %v515_v0, %v370_v63 }
 0x333   :  { %374 = vst.msk [vmem:[#allocation10] sm:$0x1] %vm373_vm10, %v371_v1 }
 0x334   :  { %593 = shalt.err (!%p590_p0)
}
 0x335   :  { %s594_s19 = scalar_lea.hbm %s747_s6, 16 }
 0x336   :  { %p595_p1 = scmp.ne.s32.totalorder %s747_s6, %s594_s19  ;;  %p598_p2 = scmp.lt.u32.totalorder %s594_s19, %s747_s6 }
 0x338   :  { %p600_p3 = pnand %p598_p2, %p595_p1 }
 0x33a   :  { %603 = shalt.err (!%p600_p3)
}
 0x33b   :  { %384 = dma.vmem_to_hbm [thread:$0]  %s382_s4, 16, %s747_s6, [#allocation6]  }
 0x33c   :  { %608 = dma.done.wait [#allocation6], 16  }
 0x33d   :  { %609 = vsyncadd [#allocation6], 4294967280 }
 0x33e   :  { %388 = vsyncpa [#allocation5], 1 }
 0x33f   :  { %389 = vsyncpa [#allocation8], 1 }
 0x340   :  { %390 = vsyncpa [#allocation6], 1 }

</bundles_post_ra>
